<compile_context>
chip_gen: v5e
topology: v5e:2x2
jax: 0.10.0
libtpu: 0.0.40
codegen_flags: <defaults>
</compile_context>

<pallas_src>
import jax
import jax.numpy as jnp
from jax.experimental import pallas as pl
from jax.experimental.pallas import tpu as pltpu


def _hbm_copy_kernel(x_hbm, o_hbm, sem):
    # One HBM->HBM DMA descriptor covering the whole array: no VMEM staging,
    # no grid loop, no tile tuning.  Full-ref copy (same shape/dtype/layout).
    cp = pltpu.make_async_copy(x_hbm, o_hbm, sem)
    cp.start()
    cp.wait()


class GANPallas:
    """Pallas analogue of the sparselearning GAN base class (fixed res)."""

    def __init__(self, res):
        self._res = res

    @property
    def res(self):
        return self._res

    @res.setter
    def res(self, new_res):
        raise AttributeError(
            f"GAN().res cannot be changed, as {self.__class__.__name__} only "
            f"permits one resolution: {self._res}."
        )

    def most_parameters(self, recurse=True, excluded_params: list = []):
        # TODO(synk): abstract base has no parameters; concrete subclasses
        # would filter their param pytree here.
        return iter(())

    def forward(self, x):
        # x: (N, C, H, W) with H == W == self._res (PyTorch NCHW layout kept
        # at the wrapper boundary; the DMA copies the buffer as-is).
        n, c, h, w = x.shape
        assert h == self._res and w == self._res, (
            f"GAN only permits one resolution: {self._res}"
        )

        nbytes = x.size * jnp.dtype(x.dtype).itemsize
        return pl.pallas_call(
            _hbm_copy_kernel,
            out_shape=jax.ShapeDtypeStruct(x.shape, x.dtype),
            in_specs=[pl.BlockSpec(memory_space=pl.ANY)],   # stay in HBM
            out_specs=pl.BlockSpec(memory_space=pl.ANY),    # stay in HBM
            scratch_shapes=[pltpu.SemaphoreType.DMA],
            cost_estimate=pl.CostEstimate(
                flops=0, transcendentals=0, bytes_accessed=2 * nbytes
            ),
        )(x)

    def __call__(self, x):
        return self.forward(x)


if __name__ == "__main__":
    key = jax.random.PRNGKey(0)

    # Small demo at the module's natural shape: (N=2, C=4, H=W=res=16).
    res = 16
    x = jax.random.normal(key, (2, 4, res, res), dtype=jnp.float32)  # NCHW
    gan = GANPallas(res=res)
    y = jax.block_until_ready(gan(x))
    assert y.shape == x.shape and y.dtype == x.dtype
    assert bool(jnp.allclose(y, x))

    # Larger input (8 MiB f32) -- same single-DMA path, no tiling needed.
    res2 = 256
    x2 = jnp.arange(4 * 8 * res2 * res2, dtype=jnp.float32).reshape(
        4, 8, res2, res2
    )
    gan2 = GANPallas(res=res2)
    y2 = jax.block_until_ready(gan2(x2))
    assert y2.shape == x2.shape and y2.dtype == x2.dtype
    assert bool(jnp.array_equal(y2, x2))

    # Non-f32 / awkward-size case (previously needed masked-store fallbacks).
    res3 = 24
    x3 = jax.random.normal(key, (3, 5, res3, res3), dtype=jnp.bfloat16)
    gan3 = GANPallas(res=res3)
    y3 = jax.block_until_ready(gan3(x3))
    assert y3.shape == x3.shape and y3.dtype == x3.dtype
    assert bool(jnp.array_equal(y3, x3))

    print("KERNEL_OK")
</pallas_src>

<mosaic_0001>
module attributes {stable_mosaic.version = 11 : i64} {
  func.func @_hbm_copy_kernel(%arg0: memref<2x4x16x16xf32, #tpu.memory_space<any>>, %arg1: memref<2x4x16x16xf32, #tpu.memory_space<any>>, %arg2: memref<!tpu.dma_semaphore, #tpu.memory_space<semaphore_mem>>) attributes {dimension_semantics = [], scalar_prefetch = 0 : i64, scratch_operands = 1 : i64, tpu.core_type = #tpu.core_type<tc>} {
    tpu.enqueue_dma source(%arg0 : memref<2x4x16x16xf32, #tpu.memory_space<any>>) target(%arg1 : memref<2x4x16x16xf32, #tpu.memory_space<any>>) target_semaphore(%arg2 : memref<!tpu.dma_semaphore, #tpu.memory_space<semaphore_mem>>)
    tpu.wait_dma2 semaphore(%arg2 : memref<!tpu.dma_semaphore, #tpu.memory_space<semaphore_mem>>) src(%arg0 : memref<2x4x16x16xf32, #tpu.memory_space<any>>) dst(%arg1 : memref<2x4x16x16xf32, #tpu.memory_space<any>>)
    return
  }
}

</mosaic_0001>

<bundles_post_ra>
// kernel: tpu_custom_call.1
= control target key start
LH: loop header
LB: loop body
LE: loop exit
PB: predicated region body
PF: predicated region fallthrough
CT: control target
= control target key end

     0   :  { %s34_s12 = smov [#allocation2]   ;;  %s35_s13 = smov [#allocation3]   ;;  %s53_s0 = inlined_call_operand.hbm [shape: f32[2,4,16,16], index: 0, kind: input, shape index: {}]   ;;  %s54_s1 = inlined_call_operand.hbm [shape: f32[2,4,16,16], index: 1, kind: output, shape index: {}]  }
   0x1   :  { %s10_s8 = sshll.u32 %s53_s0, 4  ;;  %s12_s11 = sshll.u32 %s54_s1, 4  ;;  %s11_s8 = int_to_ptr.hbm [resolvable:$true] %s10_s8  ;;  %s13_s11 = int_to_ptr.hbm [resolvable:$true] %s12_s11 }
   0x2   :  { %s36_s14 = smov 0  }
   0x3   :  { %16 = dma.general %s11_s8, 2048, %s13_s11, %s34_s12, %s35_s13, [#allocation4], %s36_s14, 0  }
   0x4   :  { %32 = dma.done.wait [#allocation2], 2048 }
   0x5   :  { %33 = vsyncadd [#allocation2], 4294965248 }
   0x6   :  { %22 = vsyncmov [#allocation2] }
   0x9   :  { %s23_s15 = vpop.sfrf %22 }
   0xa   :  { %p28_p0 = scmp.ne.s32.totalorder %s23_s15, 0 }
   0xc   :  { %27 = shalt.err (%p28_p0)  }

</bundles_post_ra>
